<compile_context>
chip_gen: v7x
topology: tpu7x:2x2x1
jax: 0.10.0
libtpu: 0.0.40
codegen_flags: <defaults>
</compile_context>

<pallas_src>
import jax
import jax.numpy as jnp
from jax import lax
from jax.experimental import pallas as pl
from jax.experimental.pallas import tpu as pltpu


# -----------------------------------------------------------------------------
# Kernel 1: BatchNorm1d (batch stats) + both linear projections.
# Whole-array block (tensors are only N x C / N x 256); outputs bf16 MXU operands.
# -----------------------------------------------------------------------------
def prep_kernel(h_ref, g_ref, b_ref, wt_ref, bt_ref, wo_ref, bo_ref, hx_ref, ho_ref):
    H = h_ref[...]                                            # (N, C) f32
    mean = jnp.mean(H, axis=0, keepdims=True)
    var = jnp.mean((H - mean) ** 2, axis=0, keepdims=True)    # biased var (training mode)
    Hn = (H - mean) * lax.rsqrt(var + 1e-5) * g_ref[...] + b_ref[...]
    # Weights arrive pre-transposed as (C, out): plain NN matmuls, no in-kernel .T
    hx = jnp.dot(Hn, wt_ref[...], preferred_element_type=jnp.float32) + bt_ref[...]
    ho = jnp.dot(Hn, wo_ref[...], preferred_element_type=jnp.float32) + bo_ref[...]
    hx_ref[...] = hx.astype(jnp.bfloat16)                     # (N, 256)
    ho_ref[...] = ho.astype(jnp.bfloat16)                     # (N, P)  (lane-padded)


# -----------------------------------------------------------------------------
# Kernel 2 (row-block grid): A_new = clamp(sigmoid(Hx Hxᵀ), 0.03) * A_in + I,
# plus rsqrt of the per-row degree. NT matmul on bf16 operands, f32 accumulation.
# -----------------------------------------------------------------------------
def adj_kernel(hx_blk_ref, hx_all_ref, a_ref, a_out_ref, disq_ref):
    i = pl.program_id(0)
    # (TM, 256) x (N, 256) contracted on dim 1 of both -> (TM, N); no transpose emitted.
    logits = lax.dot_general(
        hx_blk_ref[...], hx_all_ref[...],
        dimension_numbers=(((1,), (1,)), ((), ())),
        preferred_element_type=jnp.float32)
    # sigmoid(x) = 0.5*tanh(0.5*x) + 0.5  (single EUP transcendental), then clamp(min=0.03)
    s = jnp.maximum(0.5 * jnp.tanh(0.5 * logits) + 0.5, 0.03)
    a_blk = s * a_ref[...]                                    # (TM, N) f32
    tm, n = a_blk.shape
    # block-local identity add: global_row == col
    row = lax.broadcasted_iota(jnp.int32, (tm, n), 0) + i * tm
    col = lax.broadcasted_iota(jnp.int32, (tm, n), 1)
    a_blk = jnp.where(row == col, a_blk + 1.0, a_blk)
    a_out_ref[...] = a_blk
    disq_ref[...] = lax.rsqrt(jnp.sum(a_blk, axis=1, keepdims=True))   # (TM, 1)


# -----------------------------------------------------------------------------
# Kernel 3 (row-block grid): out = LeakyReLU( (Dh A Dh) @ Ho ), bf16 MXU operands.
# -----------------------------------------------------------------------------
def agg_kernel(a_ref, dr_ref, dc_ref, ho_ref, out_ref):
    a_hat = a_ref[...] * dr_ref[...] * dc_ref[...]            # (TM, N) * (TM,1) * (1,N)
    out = jnp.dot(a_hat.astype(jnp.bfloat16), ho_ref[...],
                  preferred_element_type=jnp.float32)         # (TM, P)
    out_ref[...] = jnp.where(out >= 0, out, 0.01 * out)       # LeakyReLU(0.01)


def _vmem_limit_bytes():
    """Generation-aware VMEM limit: ~75% of physical capacity (48 MiB on v7x, 96 MiB on v5e/v6e)."""
    try:
        cap = int(pltpu.get_tpu_info().vmem_capacity_bytes)
    except Exception:
        cap = 64 << 20
    return max(32 << 20, min(cap * 3 // 4, 100 << 20))


def gcn_layer(H, A, bn_gamma, bn_beta, W_theta, b_theta, W_out, b_out):
    N, C = H.shape
    hidden = W_theta.shape[0]      # 256
    out_dim = W_out.shape[0]
    P = max(128, ((out_dim + 127) // 128) * 128)   # lane-pad the output feature dim
    f32 = jnp.float32

    # Host-side (XLA) layout prep: transpose weights once to (in, out); zero-pad to P lanes.
    Wt_T = W_theta.T.astype(f32)                                           # (C, 256)
    Wo_T = jnp.zeros((C, P), f32).at[:, :out_dim].set(W_out.T.astype(f32)) # (C, P)
    bt = b_theta.reshape(1, hidden).astype(f32)
    bo = jnp.zeros((1, P), f32).at[:, :out_dim].set(b_out.reshape(1, -1).astype(f32))
    g = bn_gamma.reshape(1, C).astype(f32)
    b = bn_beta.reshape(1, C).astype(f32)

    vmem_limit = _vmem_limit_bytes()

    def full(shape):
        # Whole-array block on a trivial 1-point grid.
        return pl.BlockSpec(shape, lambda i: (0,) * len(shape))

    # --- Stage 1: BN + linears (small, single block) ---
    prep_in = (H.astype(f32), g, b, Wt_T, bt, Wo_T, bo)
    Hx, Ho = pl.pallas_call(
        prep_kernel,
        grid=(1,),
        out_shape=(jax.ShapeDtypeStruct((N, hidden), jnp.bfloat16),
                   jax.ShapeDtypeStruct((N, P), jnp.bfloat16)),
        in_specs=[full(x.shape) for x in prep_in],
        out_specs=(full((N, hidden)), full((N, P))),
        compiler_params=pltpu.CompilerParams(vmem_limit_bytes=vmem_limit),
    )(*prep_in)

    # Row-block tiling for the N x N stages (bounded VMEM working set, scales with N).
    TM = 128 if N % 128 == 0 else N
    nblk = N // TM

    # --- Stage 2: adjacency refinement + per-row rsqrt(degree) ---
    A_new, d_isqrt = pl.pallas_call(
        adj_kernel,
        grid=(nblk,),
        out_shape=(jax.ShapeDtypeStruct((N, N), f32),
                   jax.ShapeDtypeStruct((N, 1), f32)),
        in_specs=[pl.BlockSpec((TM, hidden), lambda i: (i, 0)),   # Hx row block
                  pl.BlockSpec((N, hidden), lambda i: (0, 0)),    # Hx (all rows)
                  pl.BlockSpec((TM, N), lambda i: (i, 0))],       # A_in row block
        out_specs=(pl.BlockSpec((TM, N), lambda i: (i, 0)),
                   pl.BlockSpec((TM, 1), lambda i: (i, 0))),
        compiler_params=pltpu.CompilerParams(
            dimension_semantics=("parallel",), vmem_limit_bytes=vmem_limit),
    )(Hx, Hx, A.astype(f32))

    # --- Stage 3: normalized aggregation + LeakyReLU ---
    d_row = d_isqrt.reshape(1, N)
    out_padded = pl.pallas_call(
        agg_kernel,
        grid=(nblk,),
        out_shape=jax.ShapeDtypeStruct((N, P), f32),
        in_specs=[pl.BlockSpec((TM, N), lambda i: (i, 0)),        # A_new row block
                  pl.BlockSpec((TM, 1), lambda i: (i, 0)),        # rsqrt(d) rows of block
                  pl.BlockSpec((1, N), lambda i: (0, 0)),         # rsqrt(d) all columns
                  pl.BlockSpec((N, P), lambda i: (0, 0))],        # Ho (all rows)
        out_specs=pl.BlockSpec((TM, P), lambda i: (i, 0)),
        compiler_params=pltpu.CompilerParams(
            dimension_semantics=("parallel",), vmem_limit_bytes=vmem_limit),
    )(A_new, d_isqrt, d_row, Ho)

    return out_padded[:, :out_dim], A_new


if __name__ == "__main__":
    # Small deterministic problem exercising the row-block grid (2 blocks of 128 rows).
    N, input_dim, output_dim = 256, 32, 16
    hidden = 256  # fixed by the module (GCN_liner_theta_1 -> 256)

    key = jax.random.PRNGKey(0)
    k_h, k_a, k_wt, k_bt, k_wo, k_bo = jax.random.split(key, 6)

    H = jax.random.normal(k_h, (N, input_dim), dtype=jnp.float32)

    # Adjacency: symmetric, non-negative (row sums > 0, as the module assumes).
    A_raw = jax.random.uniform(k_a, (N, N), dtype=jnp.float32)
    A = 0.5 * (A_raw + A_raw.T)

    bn_gamma = jnp.ones((input_dim,), dtype=jnp.float32)
    bn_beta = jnp.zeros((input_dim,), dtype=jnp.float32)
    W_theta = 0.05 * jax.random.normal(k_wt, (hidden, input_dim), dtype=jnp.float32)
    b_theta = 0.05 * jax.random.normal(k_bt, (hidden,), dtype=jnp.float32)
    W_out = 0.05 * jax.random.normal(k_wo, (output_dim, input_dim), dtype=jnp.float32)
    b_out = 0.05 * jax.random.normal(k_bo, (output_dim,), dtype=jnp.float32)

    out, A_new = gcn_layer(H, A, bn_gamma, bn_beta, W_theta, b_theta, W_out, b_out)
    jax.block_until_ready((out, A_new))

    # Pure-JAX f32 reference (loose tolerance: the two N x N matmuls use bf16 operands).
    mean = jnp.mean(H, 0, keepdims=True)
    var = jnp.mean((H - mean) ** 2, 0, keepdims=True)
    Hn = (H - mean) / jnp.sqrt(var + 1e-5) * bn_gamma + bn_beta
    Hx_ref = Hn @ W_theta.T + b_theta
    S_ref = jnp.maximum(jax.nn.sigmoid(Hx_ref @ Hx_ref.T), 0.03)
    A_ref = S_ref * A + jnp.eye(N, dtype=jnp.float32)
    d_is = jnp.sum(A_ref, 1) ** -0.5
    A_hat = A_ref * d_is[:, None] * d_is[None, :]
    out_ref = A_hat @ (Hn @ W_out.T + b_out)
    out_ref = jnp.where(out_ref >= 0, out_ref, 0.01 * out_ref)

    assert out.shape == (N, output_dim) and A_new.shape == (N, N)
    assert jnp.all(jnp.isfinite(out)) and jnp.all(jnp.isfinite(A_new))
    assert float(jnp.max(jnp.abs(A_new - A_ref))) < 2e-2
    assert float(jnp.max(jnp.abs(out - out_ref))) < 2e-2
    print("KERNEL_OK")
</pallas_src>

<mosaic_0001>
module attributes {stable_mosaic.version = 11 : i64} {
  func.func @prep_kernel(%arg0: i32, %arg1: memref<256x32xf32, #tpu.memory_space<vmem>>, %arg2: memref<1x32xf32, #tpu.memory_space<vmem>>, %arg3: memref<1x32xf32, #tpu.memory_space<vmem>>, %arg4: memref<32x256xf32, #tpu.memory_space<vmem>>, %arg5: memref<1x256xf32, #tpu.memory_space<vmem>>, %arg6: memref<32x128xf32, #tpu.memory_space<vmem>>, %arg7: memref<1x128xf32, #tpu.memory_space<vmem>>, %arg8: memref<256x256xbf16, #tpu.memory_space<vmem>>, %arg9: memref<256x128xbf16, #tpu.memory_space<vmem>>) attributes {dimension_semantics = [#tpu.dimension_semantics<arbitrary>], iteration_bounds = array<i64: 1>, scalar_prefetch = 0 : i64, scratch_operands = 0 : i64, tpu.core_type = #tpu.core_type<tc>, window_params = [{pipeline_mode = #tpu.pipeline_mode<synchronous>, transform_indices = @transform_0, window_bounds = array<i64: 256, 32>}, {pipeline_mode = #tpu.pipeline_mode<synchronous>, transform_indices = @transform_1, window_bounds = array<i64: 1, 32>}, {pipeline_mode = #tpu.pipeline_mode<synchronous>, transform_indices = @transform_2, window_bounds = array<i64: 1, 32>}, {pipeline_mode = #tpu.pipeline_mode<synchronous>, transform_indices = @transform_3, window_bounds = array<i64: 32, 256>}, {pipeline_mode = #tpu.pipeline_mode<synchronous>, transform_indices = @transform_4, window_bounds = array<i64: 1, 256>}, {pipeline_mode = #tpu.pipeline_mode<synchronous>, transform_indices = @transform_5, window_bounds = array<i64: 32, 128>}, {pipeline_mode = #tpu.pipeline_mode<synchronous>, transform_indices = @transform_6, window_bounds = array<i64: 1, 128>}, {pipeline_mode = #tpu.pipeline_mode<synchronous>, transform_indices = @transform_7, window_bounds = array<i64: 256, 256>}, {pipeline_mode = #tpu.pipeline_mode<synchronous>, transform_indices = @transform_8, window_bounds = array<i64: 256, 128>}]} {
    %c0 = arith.constant 0 : index
    %c0_0 = arith.constant 0 : index
    %0 = vector.load %arg1[%c0, %c0_0] : memref<256x32xf32, #tpu.memory_space<vmem>>, vector<256x32xf32>
    %cst = arith.constant dense<0.000000e+00> : vector<32xf32>
    %1 = vector.multi_reduction <add>, %0, %cst [0] : vector<256x32xf32> to vector<32xf32>
    %2 = vector.shape_cast %1 : vector<32xf32> to vector<1x32xf32>
    %cst_1 = arith.constant 2.560000e+02 : f32
    %3 = vector.broadcast %cst_1 : f32 to vector<1x32xf32>
    %4 = arith.divf %2, %3 : vector<1x32xf32>
    %5 = vector.broadcast %4 : vector<1x32xf32> to vector<256x32xf32>
    %6 = arith.subf %0, %5 : vector<256x32xf32>
    %7 = arith.mulf %6, %6 : vector<256x32xf32>
    %cst_2 = arith.constant dense<0.000000e+00> : vector<32xf32>
    %8 = vector.multi_reduction <add>, %7, %cst_2 [0] : vector<256x32xf32> to vector<32xf32>
    %9 = vector.shape_cast %8 : vector<32xf32> to vector<1x32xf32>
    %cst_3 = arith.constant 2.560000e+02 : f32
    %10 = vector.broadcast %cst_3 : f32 to vector<1x32xf32>
    %11 = arith.divf %9, %10 : vector<1x32xf32>
    %12 = vector.broadcast %4 : vector<1x32xf32> to vector<256x32xf32>
    %13 = arith.subf %0, %12 : vector<256x32xf32>
    %cst_4 = arith.constant 9.99999974E-6 : f32
    %14 = vector.broadcast %cst_4 : f32 to vector<1x32xf32>
    %15 = arith.addf %11, %14 : vector<1x32xf32>
    %16 = math.rsqrt %15 : vector<1x32xf32>
    %17 = vector.broadcast %16 : vector<1x32xf32> to vector<256x32xf32>
    %18 = arith.mulf %13, %17 : vector<256x32xf32>
    %c0_5 = arith.constant 0 : index
    %c0_6 = arith.constant 0 : index
    %19 = vector.load %arg2[%c0_5, %c0_6] : memref<1x32xf32, #tpu.memory_space<vmem>>, vector<1x32xf32>
    %20 = vector.broadcast %19 : vector<1x32xf32> to vector<256x32xf32>
    %21 = arith.mulf %18, %20 : vector<256x32xf32>
    %c0_7 = arith.constant 0 : index
    %c0_8 = arith.constant 0 : index
    %22 = vector.load %arg3[%c0_7, %c0_8] : memref<1x32xf32, #tpu.memory_space<vmem>>, vector<1x32xf32>
    %23 = vector.broadcast %22 : vector<1x32xf32> to vector<256x32xf32>
    %24 = arith.addf %21, %23 : vector<256x32xf32>
    %c0_9 = arith.constant 0 : index
    %c0_10 = arith.constant 0 : index
    %25 = vector.load %arg4[%c0_9, %c0_10] : memref<32x256xf32, #tpu.memory_space<vmem>>, vector<32x256xf32>
    %cst_11 = arith.constant dense<0.000000e+00> : vector<256x256xf32>
    %26 = tpu.matmul %24, %25, %cst_11 {dimension_numbers = #tpu.dot_dimension_numbers<[1], [0], [0], [1], [0, 0, 1, 1], [], []>} : vector<256x32xf32>, vector<32x256xf32>, vector<256x256xf32> -> vector<256x256xf32>
    %c0_12 = arith.constant 0 : index
    %c0_13 = arith.constant 0 : index
    %27 = vector.load %arg5[%c0_12, %c0_13] : memref<1x256xf32, #tpu.memory_space<vmem>>, vector<1x256xf32>
    %28 = vector.broadcast %27 : vector<1x256xf32> to vector<256x256xf32>
    %29 = arith.addf %26, %28 : vector<256x256xf32>
    %c0_14 = arith.constant 0 : index
    %c0_15 = arith.constant 0 : index
    %30 = vector.load %arg6[%c0_14, %c0_15] : memref<32x128xf32, #tpu.memory_space<vmem>>, vector<32x128xf32>
    %cst_16 = arith.constant dense<0.000000e+00> : vector<256x128xf32>
    %31 = tpu.matmul %24, %30, %cst_16 {dimension_numbers = #tpu.dot_dimension_numbers<[1], [0], [0], [1], [0, 0, 1, 1], [], []>} : vector<256x32xf32>, vector<32x128xf32>, vector<256x128xf32> -> vector<256x128xf32>
    %c0_17 = arith.constant 0 : index
    %c0_18 = arith.constant 0 : index
    %32 = vector.load %arg7[%c0_17, %c0_18] : memref<1x128xf32, #tpu.memory_space<vmem>>, vector<1x128xf32>
    %33 = vector.broadcast %32 : vector<1x128xf32> to vector<256x128xf32>
    %34 = arith.addf %31, %33 : vector<256x128xf32>
    %35 = arith.truncf %29 : vector<256x256xf32> to vector<256x256xbf16>
    %c0_19 = arith.constant 0 : index
    %c0_20 = arith.constant 0 : index
    %36 = vector.load %arg8[%c0_19, %c0_20] : memref<256x256xbf16, #tpu.memory_space<vmem>>, vector<256x256xbf16>
    tpu.vector_store %arg8[%c0_19, %c0_20], %35 {strides = array<i32>} : memref<256x256xbf16, #tpu.memory_space<vmem>>, vector<256x256xbf16>,
    %37 = arith.truncf %34 : vector<256x128xf32> to vector<256x128xbf16>
    %c0_21 = arith.constant 0 : index
    %c0_22 = arith.constant 0 : index
    %38 = vector.load %arg9[%c0_21, %c0_22] : memref<256x128xbf16, #tpu.memory_space<vmem>>, vector<256x128xbf16>
    tpu.vector_store %arg9[%c0_21, %c0_22], %37 {strides = array<i32>} : memref<256x128xbf16, #tpu.memory_space<vmem>>, vector<256x128xbf16>,
    return
  }
  func.func @transform_0(%arg0: i32) -> (i32, i32) {
    %c0_i32 = arith.constant 0 : i32
    %c0_i32_0 = arith.constant 0 : i32
    %c0_i32_1 = arith.constant 0 : i32
    return %c0_i32, %c0_i32_0 : i32, i32
  }
  func.func @transform_1(%arg0: i32) -> (i32, i32) {
    %c0_i32 = arith.constant 0 : i32
    %c0_i32_0 = arith.constant 0 : i32
    %c0_i32_1 = arith.constant 0 : i32
    return %c0_i32, %c0_i32_0 : i32, i32
  }
  func.func @transform_2(%arg0: i32) -> (i32, i32) {
    %c0_i32 = arith.constant 0 : i32
    %c0_i32_0 = arith.constant 0 : i32
    %c0_i32_1 = arith.constant 0 : i32
    return %c0_i32, %c0_i32_0 : i32, i32
  }
  func.func @transform_3(%arg0: i32) -> (i32, i32) {
    %c0_i32 = arith.constant 0 : i32
    %c0_i32_0 = arith.constant 0 : i32
    %c0_i32_1 = arith.constant 0 : i32
    return %c0_i32, %c0_i32_0 : i32, i32
  }
  func.func @transform_4(%arg0: i32) -> (i32, i32) {
    %c0_i32 = arith.constant 0 : i32
    %c0_i32_0 = arith.constant 0 : i32
    %c0_i32_1 = arith.constant 0 : i32
    return %c0_i32, %c0_i32_0 : i32, i32
  }
  func.func @transform_5(%arg0: i32) -> (i32, i32) {
    %c0_i32 = arith.constant 0 : i32
    %c0_i32_0 = arith.constant 0 : i32
    %c0_i32_1 = arith.constant 0 : i32
    return %c0_i32, %c0_i32_0 : i32, i32
  }
  func.func @transform_6(%arg0: i32) -> (i32, i32) {
    %c0_i32 = arith.constant 0 : i32
    %c0_i32_0 = arith.constant 0 : i32
    %c0_i32_1 = arith.constant 0 : i32
    return %c0_i32, %c0_i32_0 : i32, i32
  }
  func.func @transform_7(%arg0: i32) -> (i32, i32) {
    %c0_i32 = arith.constant 0 : i32
    %c0_i32_0 = arith.constant 0 : i32
    %c0_i32_1 = arith.constant 0 : i32
    return %c0_i32, %c0_i32_0 : i32, i32
  }
  func.func @transform_8(%arg0: i32) -> (i32, i32) {
    %c0_i32 = arith.constant 0 : i32
    %c0_i32_0 = arith.constant 0 : i32
    %c0_i32_1 = arith.constant 0 : i32
    return %c0_i32, %c0_i32_0 : i32, i32
  }
}

</mosaic_0001>

<bundles_post_ra>
// kernel: tpu_custom_call.1
= control target key start
LH: loop header
LB: loop body
LE: loop exit
PB: predicated region body
PF: predicated region fallthrough
CT: control target
= control target key end

     0   :  { %14 = vsyncpa [#allocation3], 0  ;;  %v1864_v7 = vmov 0.0   ;;  %vm62_vm0 = vcmask 261120   ;;  %s2849_s0 = inlined_call_operand.vmem [shape: f32[256,32], index: 0, kind: input, shape index: {}]   ;;  %s2850_s1 = inlined_call_operand.vmem [shape: f32[1,32], index: 1, kind: input, shape index: {}]   ;;  %s2851_s2 = inlined_call_operand.vmem [shape: f32[1,32], index: 2, kind: input, shape index: {}]   ;;  %s2852_s3 = inlined_call_operand.vmem [shape: f32[32,256], index: 3, kind: input, shape index: {}]   ;;  %s2853_s4 = inlined_call_operand.vmem [shape: f32[1,256], index: 4, kind: input, shape index: {}]   ;;  %s2854_s5 = inlined_call_operand.vmem [shape: f32[32,128], index: 5, kind: input, shape index: {}]   ;;  %s2855_s6 = inlined_call_operand.vmem [shape: f32[1,128], index: 6, kind: input, shape index: {}]   ;;  %s2856_s7 = inlined_call_operand.hbm [shape: bf16[256,256], index: 7, kind: output, shape index: {0}]   ;;  %s2857_s8 = inlined_call_operand.hbm [shape: bf16[256,128], index: 8, kind: output, shape index: {1}]  }
   0x1   :  { %v381_v0 = vld [vmem:[%s2852_s3 + $0x8] sm:$0xff]  ;;  %v383_v1 = vld [vmem:[%s2852_s3 + $0x18] sm:$0xff]  ;;  %v380_v2 = vld [vmem:[%s2852_s3] sm:$0xff]  ;;  %560 = vmatprep.mubr.f32.mxu0 %v1864_v7  ;;  %704 = vmatprep.mubr.f32.mxu1 %v1864_v7 }
   0x2   :  { %v1787_v3 = vpack.c.bf16 %v383_v1, %v381_v0  ;;  %v382_v4 = vld [vmem:[%s2852_s3 + $0x10] sm:$0xff]  ;;  %v385_v5 = vld [vmem:[%s2852_s3 + $0x28] sm:$0xff]  ;;  %v387_v6 = vld [vmem:[%s2852_s3 + $0x38] sm:$0xff] }
   0x3   :  { %v1789_v8 = vpack.c.bf16 %v382_v4, %v380_v2  ;;  %v1791_v9 = vpack.c.bf16 %v387_v6, %v385_v5  ;;  %v384_v10 = vld [vmem:[%s2852_s3 + $0x20] sm:$0xff]  ;;  %v386_v11 = vld [vmem:[%s2852_s3 + $0x30] sm:$0xff]  ;;  %v754_v13 = vld [vmem:[%s2854_s5 + $0x8] sm:$0xff] }
   0x4   :  { %v753_v12 = vld [vmem:[%s2854_s5] sm:$0xff]  ;;  %1803 = vmatprep.subr.bf16.mxu1 %v1787_v3  ;;  %1788 = vmatprep.subr.bf16.mxu0 %v1787_v3  ;;  %v1956_v15 = vld [vmem:[%s2849_s0 + $0x8] sm:$0xff]  ;;  %v1793_v16 = vpack.c.bf16 %v386_v11, %v384_v10  ;;  %v1961_v17 = vld [vmem:[%s2849_s0 + $0x10] sm:$0xff] }
   0x5   :  { %v1951_v14 = vld [vmem:[%s2849_s0] sm:$0xff]  ;;  %1805 = vmatpush1.bf16.msra.mxu1 %v1789_v8  ;;  %1790 = vmatpush1.bf16.msra.mxu0 %v1789_v8  ;;  %v1966_v18 = vld [vmem:[%s2849_s0 + $0x18] sm:$0xff]  ;;  %v64_v20 = vsel %vm62_vm0, %v1956_v15, 0.0  ;;  %v1972_v21 = vpack.c.bf16 %v754_v13, %v753_v12  ;;  %v66_v24 = vsel %vm62_vm0, %v1961_v17, 0.0  ;;  %v1986_v26 = vld [vmem:[%s2849_s0 + $0x28] sm:$0xff] }
   0x6   :  { %v63_v19 = vsel %vm62_vm0, %v1951_v14, 0.0  ;;  %1804 = vmatprep.subr.bf16.mxu1 %v1791_v9  ;;  %1792 = vmatprep.subr.bf16.mxu0 %v1791_v9  ;;  %v1977_v22 = vld [vmem:[%s2849_s0 + $0x20] sm:$0xff]  ;;  %v68_v25 = vsel %vm62_vm0, %v1966_v18, 0.0  ;;  %v1994_v29 = vld [vmem:[%s2849_s0 + $0x30] sm:$0xff]  ;;  %v72_v31 = vsel %vm62_vm0, %v1986_v26, 0.0  ;;  %v2001_v32 = vld [vmem:[%s2849_s0 + $0x38] sm:$0xff] }
   0x7   :  { %v65_v23 = vadd.f32 %v64_v20, %v63_v19  ;;  %v70_v28 = vsel %vm62_vm0, %v1977_v22, 0.0  ;;  %v74_v34 = vsel %vm62_vm0, %v1994_v29, 0.0  ;;  %v2008_v35 = vld [vmem:[%s2849_s0 + $0x40] sm:$0xff]  ;;  %v76_v37 = vsel %vm62_vm0, %v2001_v32, 0.0 }
   0x9   :  { %v67_v27 = vadd.f32 %v66_v24, %v65_v23  ;;  %1806 = vmatpush1.bf16.msra.mxu1 %v1793_v16  ;;  %1794 = vmatpush1.bf16.msra.mxu0 %v1793_v16 }
   0xa   :  { %1796 = vmatprep.subr.bf16.mxu1 %v1972_v21 }
   0xb   :  { %v69_v30 = vadd.f32 %v68_v25, %v67_v27 }
   0xd   :  { %v71_v33 = vadd.f32 %v70_v28, %v69_v30 }
   0xf   :  { %v73_v36 = vadd.f32 %v72_v31, %v71_v33 }
  0x10   :  { %15 = vsyncpa [#allocation5], 0  ;;  %v2015_v38 = vld [vmem:[%s2849_s0 + $0x48] sm:$0xff]  ;;  %v78_v40 = vsel %vm62_vm0, %v2008_v35, 0.0  ;;  %v2022_v41 = vld [vmem:[%s2849_s0 + $0x50] sm:$0xff]  ;;  %s1866_s28 = smov [#allocation4]  }
  0x11   :  { %v75_v39 = vadd.f32 %v74_v34, %v73_v36  ;;  %v80_v43 = vsel %vm62_vm0, %v2015_v38, 0.0  ;;  %v2029_v44 = vld [vmem:[%s2849_s0 + $0x58] sm:$0xff]  ;;  %v82_v46 = vsel %vm62_vm0, %v2022_v41, 0.0  ;;  %v2036_v47 = vld [vmem:[%s2849_s0 + $0x60] sm:$0xff]  ;;  %v2043_v50 = vld [vmem:[%s2849_s0 + $0x68] sm:$0xff]  ;;  %s1390_s3 = sshll.u32 %s1866_s28, 4  ;;  %s2818_s3 = int_to_ptr.vmem [resolvable:$true] %s1390_s3 }
  0x12   :  { %v84_v49 = vsel %vm62_vm0, %v2029_v44, 0.0  ;;  %v86_v52 = vsel %vm62_vm0, %v2036_v47, 0.0  ;;  %v2050_v53 = vld [vmem:[%s2849_s0 + $0x70] sm:$0xff]  ;;  %v88_v55 = vsel %vm62_vm0, %v2043_v50, 0.0  ;;  %v2057_v56 = vld [vmem:[%s2849_s0 + $0x78] sm:$0xff]  ;;  %v2064_v59 = vld [vmem:[%s2849_s0 + $0x80] sm:$0xff] }
  0x13   :  { %v77_v42 = vadd.f32 %v76_v37, %v75_v39  ;;  %v90_v58 = vsel %vm62_vm0, %v2050_v53, 0.0  ;;  %v92_v61 = vsel %vm62_vm0, %v2057_v56, 0.0  ;;  %v2071_v62 = vld [vmem:[%s2849_s0 + $0x88] sm:$0xff]  ;;  %v94_v0 = vsel %vm62_vm0, %v2064_v59, 0.0  ;;  %v2078_v1 = vld [vmem:[%s2849_s0 + $0x90] sm:$0xff]  ;;  %v2085_v4 = vld [vmem:[%s2849_s0 + $0x98] sm:$0xff] }
  0x14   :  { %v96_v3 = vsel %vm62_vm0, %v2071_v62, 0.0  ;;  %v98_v6 = vsel %vm62_vm0, %v2078_v1, 0.0  ;;  %v2092_v8 = vld [vmem:[%s2849_s0 + $0xa0] sm:$0xff]  ;;  %v100_v10 = vsel %vm62_vm0, %v2085_v4, 0.0  ;;  %v2099_v11 = vld [vmem:[%s2849_s0 + $0xa8] sm:$0xff]  ;;  %v2106_v16 = vld [vmem:[%s2849_s0 + $0xb0] sm:$0xff] }
  0x15   :  { %v79_v45 = vadd.f32 %v78_v40, %v77_v42  ;;  %v102_v13 = vsel %vm62_vm0, %v2092_v8, 0.0  ;;  %v104_v20 = vsel %vm62_vm0, %v2099_v11, 0.0  ;;  %v2113_v23 = vld [vmem:[%s2849_s0 + $0xb8] sm:$0xff]  ;;  %v106_v25 = vsel %vm62_vm0, %v2106_v16, 0.0  ;;  %v2120_v27 = vld [vmem:[%s2849_s0 + $0xc0] sm:$0xff]  ;;  %v2127_v31 = vld [vmem:[%s2849_s0 + $0xc8] sm:$0xff] }
  0x16   :  { %v108_v30 = vsel %vm62_vm0, %v2113_v23, 0.0  ;;  %v110_v34 = vsel %vm62_vm0, %v2120_v27, 0.0  ;;  %v2134_v36 = vld [vmem:[%s2849_s0 + $0xd0] sm:$0xff]  ;;  %v112_v39 = vsel %vm62_vm0, %v2127_v31, 0.0  ;;  %v2141_v40 = vld [vmem:[%s2849_s0 + $0xd8] sm:$0xff] }
  0x17   :  { %v81_v48 = vadd.f32 %v80_v43, %v79_v45  ;;  %v114_v43 = vsel %vm62_vm0, %v2134_v36, 0.0  ;;  %v2148_v45 = vld [vmem:[%s2849_s0 + $0xe0] sm:$0xff] }
  0x19   :  { %v83_v51 = vadd.f32 %v82_v46, %v81_v48  ;;  %v116_v48 = vsel %vm62_vm0, %v2141_v40, 0.0 }
  0x1b   :  { %v85_v54 = vadd.f32 %v84_v49, %v83_v51  ;;  %v2155_v49 = vld [vmem:[%s2849_s0 + $0xe8] sm:$0xff] }
  0x1d   :  { %v87_v57 = vadd.f32 %v86_v52, %v85_v54  ;;  %v118_v52 = vsel %vm62_vm0, %v2148_v45, 0.0  ;;  %v2162_v54 = vld [vmem:[%s2849_s0 + $0xf0] sm:$0xff] }
  0x1f   :  { %v89_v60 = vadd.f32 %v88_v55, %v87_v57  ;;  %v120_v57 = vsel %vm62_vm0, %v2155_v49, 0.0 }
  0x21   :  { %v91_v63 = vadd.f32 %v90_v58, %v89_v60  ;;  %v2169_v58 = vld [vmem:[%s2849_s0 + $0xf8] sm:$0xff] }
  0x23   :  { %v93_v2 = vadd.f32 %v92_v61, %v91_v63  ;;  %v122_v61 = vsel %vm62_vm0, %v2162_v54, 0.0 }
  0x25   :  { %v95_v5 = vadd.f32 %v94_v0, %v93_v2  ;;  %v124_v0 = vsel %vm62_vm0, %v2169_v58, 0.0 }
  0x27   :  { %v97_v9 = vadd.f32 %v96_v3, %v95_v5 }
  0x29   :  { %v99_v12 = vadd.f32 %v98_v6, %v97_v9 }
  0x2b   :  { %v101_v19 = vadd.f32 %v100_v10, %v99_v12 }
  0x2d   :  { %v103_v24 = vadd.f32 %v102_v13, %v101_v19 }
  0x2f   :  { %v105_v28 = vadd.f32 %v104_v20, %v103_v24 }
  0x31   :  { %v107_v33 = vadd.f32 %v106_v25, %v105_v28 }
  0x33   :  { %v109_v37 = vadd.f32 %v108_v30, %v107_v33 }
  0x35   :  { %v111_v42 = vadd.f32 %v110_v34, %v109_v37 }
  0x37   :  { %v113_v46 = vadd.f32 %v112_v39, %v111_v42 }
  0x39   :  { %v115_v51 = vadd.f32 %v114_v43, %v113_v46 }
  0x3b   :  { %v117_v55 = vadd.f32 %v116_v48, %v115_v51 }
  0x3d   :  { %v119_v60 = vadd.f32 %v118_v52, %v117_v55 }
  0x3f   :  { %v121_v63 = vadd.f32 %v120_v57, %v119_v60 }
  0x41   :  { %v123_v2 = vadd.f32 %v122_v61, %v121_v63 }
  0x43   :  { %v125_v3 = vadd.f32 %v124_v0, %v123_v2 }
  0x45   :  { %v126_v5 = vrot.slane %v125_v3, 4 }
  0x47   :  { %v127_v6 = vadd.f32 %v126_v5, %v125_v3 }
  0x49   :  { %v128_v9 = vrot.slane %v127_v6, 2 }
  0x4b   :  { %v129_v10 = vadd.f32 %v128_v9, %v127_v6 }
  0x4d   :  { %v130_v12 = vrot.slane %v129_v10, 1 }
  0x4f   :  { %v131_v13 = vadd.f32 %v130_v12, %v129_v10 }
  0x51   :  { %v2175_v19 = vmul.f32 0.00390625, %v131_v13 }
  0x53   :  { %v2179_v20 = vsub.f32 %v1951_v14, %v2175_v19  ;;  %v2183_v24 = vsub.f32 %v1956_v15, %v2175_v19  ;;  %v2187_v25 = vsub.f32 %v1961_v17, %v2175_v19  ;;  %v2191_v28 = vsub.f32 %v1966_v18, %v2175_v19 }
  0x54   :  { %v2195_v30 = vsub.f32 %v1977_v22, %v2175_v19  ;;  %v2205_v17 = vsub.f32 %v1986_v26, %v2175_v19  ;;  %v2211_v22 = vsub.f32 %v1994_v29, %v2175_v19  ;;  %v2220_v26 = vsub.f32 %v2001_v32, %v2175_v19 }
  0x55   :  { %v166_v14 = vmul.f32 %v2179_v20, %v2179_v20  ;;  %v167_v33 = vmul.f32 %v2183_v24, %v2183_v24  ;;  %v168_v15 = vmul.f32 %v2187_v25, %v2187_v25  ;;  %v169_v18 = vmul.f32 %v2191_v28, %v2191_v28 }
  0x56   :  { %v170_v34 = vmul.f32 %v2195_v30, %v2195_v30  ;;  %v171_v46 = vmul.f32 %v2205_v17, %v2205_v17  ;;  %v2227_v51 = vsub.f32 %v2008_v35, %v2175_v19  ;;  %v172_v52 = vmul.f32 %v2211_v22, %v2211_v22 }
  0x57   :  { %v198_v37 = vsel %vm62_vm0, %v166_v14, 0.0  ;;  %v199_v39 = vsel %vm62_vm0, %v167_v33, 0.0  ;;  %v201_v42 = vsel %vm62_vm0, %v168_v15, 0.0  ;;  %v203_v29 = vsel %vm62_vm0, %v169_v18, 0.0 }
  0x58   :  { %v200_v43 = vadd.f32 %v199_v39, %v198_v37  ;;  %v205_v55 = vsel %vm62_vm0, %v170_v34, 0.0  ;;  %v2234_v32 = vsub.f32 %v2015_v38, %v2175_v19  ;;  %v173_v60 = vmul.f32 %v2220_v26, %v2220_v26 }
  0x59   :  { %v207_v61 = vsel %vm62_vm0, %v171_v46, 0.0  ;;  %v2241_v35 = vsub.f32 %v2022_v41, %v2175_v19  ;;  %v174_v0 = vmul.f32 %v2227_v51, %v2227_v51  ;;  %v209_v2 = vsel %vm62_vm0, %v172_v52, 0.0 }
  0x5a   :  { %v202_v48 = vadd.f32 %v201_v42, %v200_v43  ;;  %v2248_v38 = vsub.f32 %v2029_v44, %v2175_v19  ;;  %v175_v5 = vmul.f32 %v2234_v32, %v2234_v32  ;;  %v211_v6 = vsel %vm62_vm0, %v173_v60, 0.0 }
  0x5b   :  { %v2255_v41 = vsub.f32 %v2036_v47, %v2175_v19  ;;  %v176_v10 = vmul.f32 %v2241_v35, %v2241_v35  ;;  %v213_v12 = vsel %vm62_vm0, %v174_v0, 0.0  ;;  %v2262_v44 = vsub.f32 %v2043_v50, %v2175_v19 }
  0x5c   :  { %v204_v57 = vadd.f32 %v203_v29, %v202_v48  ;;  %v177_v14 = vmul.f32 %v2248_v38, %v2248_v38  ;;  %v215_v33 = vsel %vm62_vm0, %v175_v5, 0.0  ;;  %v2269_v47 = vsub.f32 %v2050_v53, %v2175_v19 }
  0x5d   :  { %v178_v18 = vmul.f32 %v2255_v41, %v2255_v41  ;;  %v217_v34 = vsel %vm62_vm0, %v176_v10, 0.0  ;;  %v2276_v50 = vsub.f32 %v2057_v56, %v2175_v19  ;;  %v179_v39 = vmul.f32 %v2262_v44, %v2262_v44 }
  0x5e   :  { %v206_v63 = vadd.f32 %v205_v55, %v204_v57  ;;  %v219_v42 = vsel %vm62_vm0, %v177_v14, 0.0  ;;  %v2283_v53 = vsub.f32 %v2064_v59, %v2175_v19  ;;  %v180_v46 = vmul.f32 %v2269_v47, %v2269_v47 }
  0x5f   :  { %v221_v29 = vsel %vm62_vm0, %v178_v18, 0.0  ;;  %v2290_v56 = vsub.f32 %v2071_v62, %v2175_v19  ;;  %v181_v52 = vmul.f32 %v2276_v50, %v2276_v50  ;;  %v223_v55 = vsel %vm62_vm0, %v179_v39, 0.0 }
  0x60   :  { %v208_v3 = vadd.f32 %v207_v61, %v206_v63  ;;  %v2297_v59 = vsub.f32 %v2078_v1, %v2175_v19  ;;  %v182_v60 = vmul.f32 %v2283_v53, %v2283_v53  ;;  %v225_v61 = vsel %vm62_vm0, %v180_v46, 0.0 }
  0x61   :  { %v2304_v62 = vsub.f32 %v2085_v4, %v2175_v19  ;;  %v183_v0 = vmul.f32 %v2290_v56, %v2290_v56  ;;  %v2311_v1 = vsub.f32 %v2092_v8, %v2175_v19  ;;  %v2318_v4 = vsub.f32 %v2099_v11, %v2175_v19 }
  0x62   :  { %v210_v9 = vadd.f32 %v209_v2, %v208_v3  ;;  %v227_v2 = vsel %vm62_vm0, %v181_v52, 0.0  ;;  %v184_v5 = vmul.f32 %v2297_v59, %v2297_v59  ;;  %v2325_v8 = vsub.f32 %v2106_v16, %v2175_v19 }
  0x63   :  { %v185_v10 = vmul.f32 %v2304_v62, %v2304_v62  ;;  %v186_v14 = vmul.f32 %v2311_v1, %v2311_v1  ;;  %v2332_v11 = vsub.f32 %v2113_v23, %v2175_v19  ;;  %v187_v18 = vmul.f32 %v2318_v4, %v2318_v4 }
  0x64   :  { %v212_v13 = vadd.f32 %v211_v6, %v210_v9  ;;  %v229_v6 = vsel %vm62_vm0, %v182_v60, 0.0  ;;  %v158_v16 = vsub.f32 %v2120_v27, %v2175_v19  ;;  %v188_v39 = vmul.f32 %v2325_v8, %v2325_v8 }
  0x65   :  { %v159_v46 = vsub.f32 %v2127_v31, %v2175_v19  ;;  %v189_v23 = vmul.f32 %v2332_v11, %v2332_v11  ;;  %v160_v52 = vsub.f32 %v2134_v36, %v2175_v19  ;;  %v161_v60 = vsub.f32 %v2141_v40, %v2175_v19 }
  0x66   :  { %v214_v15 = vadd.f32 %v213_v12, %v212_v13  ;;  %v231_v12 = vsel %vm62_vm0, %v183_v0, 0.0  ;;  %v241_v27 = vsel %vm62_vm0, %v188_v39, 0.0  ;;  %v2355_v0 = vsub.f32 %v2148_v45, %v2175_v19 }
  0x67   :  { %v2360_v36 = vsub.f32 %v2155_v49, %v2175_v19 }
  0x68   :  { %v216_v37 = vadd.f32 %v215_v33, %v214_v15  ;;  %v233_v33 = vsel %vm62_vm0, %v184_v5, 0.0  ;;  %v194_v45 = vmul.f32 %v2355_v0, %v2355_v0 }
  0x69   :  { %v195_v49 = vmul.f32 %v2360_v36, %v2360_v36 }
  0x6a   :  { %v218_v43 = vadd.f32 %v217_v34, %v216_v37  ;;  %v235_v34 = vsel %vm62_vm0, %v185_v10, 0.0  ;;  %v2365_v10 = vsub.f32 %v2162_v54, %v2175_v19 }
  0x6b   :  { %v255_v39 = vsel %vm62_vm0, %v195_v49, 0.0 }
  0x6c   :  { %v220_v48 = vadd.f32 %v219_v42, %v218_v43  ;;  %v237_v42 = vsel %vm62_vm0, %v186_v14, 0.0  ;;  %v2372_v14 = vsub.f32 %v2169_v58, %v2175_v19  ;;  %v196_v54 = vmul.f32 %v2365_v10, %v2365_v10 }
  0x6e   :  { %v222_v57 = vadd.f32 %v221_v29, %v220_v48  ;;  %v239_v29 = vsel %vm62_vm0, %v187_v18, 0.0  ;;  %v253_v18 = vsel %vm62_vm0, %v194_v45, 0.0  ;;  %v257_v58 = vsel %vm62_vm0, %v196_v54, 0.0 }
  0x70   :  { %v224_v63 = vadd.f32 %v223_v55, %v222_v57  ;;  %v190_v55 = vmul.f32 %v158_v16, %v158_v16 }
  0x72   :  { %v226_v3 = vadd.f32 %v225_v61, %v224_v63  ;;  %v191_v61 = vmul.f32 %v159_v46, %v159_v46  ;;  %v243_v63 = vsel %vm62_vm0, %v189_v23, 0.0 }
  0x74   :  { %v228_v9 = vadd.f32 %v227_v2, %v226_v3  ;;  %v192_v2 = vmul.f32 %v160_v52, %v160_v52  ;;  %v245_v3 = vsel %vm62_vm0, %v190_v55, 0.0 }
  0x76   :  { %v230_v13 = vadd.f32 %v229_v6, %v228_v9  ;;  %v193_v6 = vmul.f32 %v161_v60, %v161_v60  ;;  %v247_v9 = vsel %vm62_vm0, %v191_v61, 0.0 }
  0x78   :  { %v232_v15 = vadd.f32 %v231_v12, %v230_v13  ;;  %v249_v12 = vsel %vm62_vm0, %v192_v2, 0.0 }
  0x7a   :  { %v234_v37 = vadd.f32 %v233_v33, %v232_v15  ;;  %v251_v33 = vsel %vm62_vm0, %v193_v6, 0.0 }
  0x7c   :  { %v236_v43 = vadd.f32 %v235_v34, %v234_v37  ;;  %v197_v37 = vmul.f32 %v2372_v14, %v2372_v14 }
  0x7e   :  { %v238_v48 = vadd.f32 %v237_v42, %v236_v43  ;;  %v259_v43 = vsel %vm62_vm0, %v197_v37, 0.0 }
  0x80   :  { %v240_v57 = vadd.f32 %v239_v29, %v238_v48 }
  0x82   :  { %v242_v31 = vadd.f32 %v241_v27, %v240_v57 }
  0x84   :  { %v244_v5 = vadd.f32 %v243_v63, %v242_v31 }
  0x86   :  { %v246_v40 = vadd.f32 %v245_v3, %v244_v5  ;;  %v2390_v5 = vld [vmem:[%s2850_s1] ss:$0 sm:$0xff] }
  0x88   :  { %v248_v13 = vadd.f32 %v247_v9, %v246_v40 }
  0x8a   :  { %v250_v15 = vadd.f32 %v249_v12, %v248_v13  ;;  %v2401_v12 = vld [vmem:[%s2851_s2] ss:$0 sm:$0xff] }
  0x8c   :  { %v252_v34 = vadd.f32 %v251_v33, %v250_v15 }
  0x8e   :  { %v254_v42 = vadd.f32 %v253_v18, %v252_v34 }
  0x90   :  { %v256_v19 = vadd.f32 %v255_v39, %v254_v42 }
  0x92   :  { %v258_v23 = vadd.f32 %v257_v58, %v256_v19 }
  0x94   :  { %v260_v29 = vadd.f32 %v259_v43, %v258_v23 }
  0x96   :  { %v261_v48 = vrot.slane %v260_v29, 4 }
  0x98   :  { %v262_v55 = vadd.f32 %v261_v48, %v260_v29 }
  0x9a   :  { %v263_v27 = vrot.slane %v262_v55, 2 }
  0x9c   :  { %v264_v57 = vadd.f32 %v263_v27, %v262_v55 }
  0x9e   :  { %v265_v61 = vrot.slane %v264_v57, 1 }
  0xa0   :  { %v266_v63 = vadd.f32 %v265_v61, %v264_v57 }
  0xa2   :  { %v267_v31 = vmul.f32 0.00390625, %v266_v63 }
  0xa4   :  { %v268_v2 = vadd.f32 1e-05, %v267_v31 }
  0xa6   :  { %1814 = vrsqrt.f32 %v268_v2 }
  0xb0   :  { %v2385_v3 = vpop.eup %1814 }
  0xb1   :  { %v270_v6 = vmul.f32 %v2385_v3, %v2179_v20  ;;  %v294_v9 = vmul.f32 %v2385_v3, %v158_v16  ;;  %v271_v40 = vmul.f32 %v2385_v3, %v2183_v24  ;;  %v295_v45 = vmul.f32 %v2385_v3, %v159_v46  ;;  %v755_v20 = vld [vmem:[%s2854_s5 + $0x10] sm:$0xff]  ;;  %v756_v24 = vld [vmem:[%s2854_s5 + $0x18] sm:$0xff] }
  0xb2   :  { %v272_v13 = vmul.f32 %v2385_v3, %v2187_v25  ;;  %v296_v49 = vmul.f32 %v2385_v3, %v160_v52  ;;  %v1799_v54 = vpack.c.bf16 %v756_v24, %v755_v20  ;;  %v273_v34 = vmul.f32 %v2385_v3, %v2191_v28 }
  0xb3   :  { %v309_v16 = vmul.f32 %v2390_v5, %v270_v6  ;;  %v333_v46 = vmul.f32 %v2390_v5, %v294_v9  ;;  %v310_v33 = vmul.f32 %v2390_v5, %v271_v40  ;;  %v334_v15 = vmul.f32 %v2390_v5, %v295_v45 }
  0xb4   :  { %v311_v18 = vmul.f32 %v2390_v5, %v272_v13  ;;  %v297_v37 = vmul.f32 %v2385_v3, %v161_v60  ;;  %v335_v58 = vmul.f32 %v2390_v5, %v296_v49  ;;  %v312_v60 = vmul.f32 %v2390_v5, %v273_v34 }
  0xb5   :  { %v2417_v25 = vadd.f32 %v2401_v12, %v309_v16  ;;  %v2420_v52 = vadd.f32 %v2401_v12, %v333_v46  ;;  %v2431_v39 = vadd.f32 %v2401_v12, %v310_v33  ;;  %v2434_v42 = vadd.f32 %v2401_v12, %v334_v15 }
  0xb6   :  { %v2441_v28 = vadd.f32 %v2401_v12, %v311_v18  ;;  %v336_v19 = vmul.f32 %v2390_v5, %v297_v37  ;;  %v274_v43 = vmul.f32 %v2385_v3, %v2195_v30  ;;  %v298_v23 = vmul.f32 %v2385_v3, %v2355_v0 }
  0xb7   :  { %1407 = vmatmul.mubr.msk.f32.vlgmr.msra.gmra.mrb[0].mxu0 %vm62_vm0, %v2417_v25  ;;  %1431 = vmatmul.mubr.msk.f32.vlgmr.msra.gmra.mrb[0].mxu1 %vm62_vm0, %v2420_v52  ;;  %v275_v29 = vmul.f32 %v2385_v3, %v2205_v17  ;;  %v2461_v48 = vadd.f32 %v2401_v12, %v312_v60  ;;  %v299_v55 = vmul.f32 %v2385_v3, %v2360_v36 }
  0xb8   :  { %1798 = vmatpush3.bf16.msra.mxu1 %v1972_v21  ;;  %566 = vmatprep.mubr.f32.mxu0 %v1864_v7  ;;  %v2450_v21 = vadd.f32 %v2401_v12, %v335_v58  ;;  %v276_v30 = vmul.f32 %v2385_v3, %v2211_v22  ;;  %v2472_v0 = vadd.f32 %v2401_v12, %v336_v19 }
  0xb9   :  { %710 = vmatprep.mubr.f32.mxu1 %v1864_v7  ;;  %1800 = vmatprep.subr.bf16.mxu1 %v1799_v54  ;;  %v313_v17 = vmul.f32 %v2390_v5, %v274_v43  ;;  %v337_v27 = vmul.f32 %v2390_v5, %v298_v23  ;;  %v300_v22 = vmul.f32 %v2385_v3, %v2365_v10 }
  0xba   :  { %v314_v36 = vmul.f32 %v2390_v5, %v275_v29  ;;  %v338_v57 = vmul.f32 %v2390_v5, %v299_v55  ;;  %v315_v61 = vmul.f32 %v2390_v5, %v276_v30  ;;  %v277_v2 = vmul.f32 %v2385_v3, %v2220_v26 }
  0xbb   :  { %1408 = vmatmul.mubr.msk.f32.gmra.mrb[2].mxu0 %vm62_vm0, %v2431_v39  ;;  %1432 = vmatmul.mubr.msk.f32.gmra.mrb[2].mxu1 %vm62_vm0, %v2434_v42  ;;  %v2488_v63 = vadd.f32 %v2401_v12, %v313_v17  ;;  %v2491_v31 = vadd.f32 %v2401_v12, %v337_v27  ;;  %v339_v10 = vmul.f32 %v2390_v5, %v300_v22 }
  0xbc   :  { %572 = vmatprep.mubr.f32.mxu0 %v1864_v7  ;;  %716 = vmatprep.mubr.f32.mxu1 %v1864_v7  ;;  %v287_v6 = vmul.f32 %v2385_v3, %v2290_v56  ;;  %v2501_v9 = vadd.f32 %v2401_v12, %v314_v36  ;;  %v288_v40 = vmul.f32 %v2385_v3, %v2297_v59 }
  0xbd   :  { %1802 = vmatpush3.bf16.msra.mxu1 %v1799_v54  ;;  %v289_v45 = vmul.f32 %v2385_v3, %v2304_v62  ;;  %v290_v13 = vmul.f32 %v2385_v3, %v2311_v1  ;;  %v2510_v49 = vadd.f32 %v2401_v12, %v338_v57  ;;  %v2513_v26 = vadd.f32 %v2401_v12, %v315_v61 }
  0xbe   :  { %v326_v56 = vmul.f32 %v2390_v5, %v287_v6  ;;  %v291_v20 = vmul.f32 %v2385_v3, %v2318_v4  ;;  %v301_v59 = vmul.f32 %v2385_v3, %v2372_v14  ;;  %v327_v62 = vmul.f32 %v2390_v5, %v288_v40 }
  0xbf   :  { %1409 = vmatmul.mubr.msk.f32.gmra.mrb[4].mxu0 %vm62_vm0, %v2441_v28  ;;  %1433 = vmatmul.mubr.msk.f32.gmra.mrb[4].mxu1 %vm62_vm0, %v2450_v21  ;;  %v328_v1 = vmul.f32 %v2390_v5, %v289_v45  ;;  %v2529_v24 = vadd.f32 %v2401_v12, %v339_v10  ;;  %v329_v16 = vmul.f32 %v2390_v5, %v290_v13 }
  0xc0   :  { %578 = vmatprep.mubr.f32.mxu0 %v1864_v7  ;;  %722 = vmatprep.mubr.f32.mxu1 %v1864_v7  ;;  %v2532_v4 = vadd.f32 %v2401_v12, %v326_v56  ;;  %v2536_v46 = vadd.f32 %v2401_v12, %v327_v62  ;;  %v330_v33 = vmul.f32 %v2390_v5, %v291_v20 }
  0xc1   :  { %v2539_v14 = vadd.f32 %v2401_v12, %v328_v1  ;;  %v292_v15 = vmul.f32 %v2385_v3, %v2325_v8  ;;  %v316_v54 = vmul.f32 %v2390_v5, %v277_v2  ;;  %v278_v18 = vmul.f32 %v2385_v3, %v2227_v51 }
  0xc2   :  { %v2548_v34 = vadd.f32 %v2401_v12, %v329_v16  ;;  %v293_v37 = vmul.f32 %v2385_v3, %v2332_v11  ;;  %v340_v58 = vmul.f32 %v2390_v5, %v301_v59  ;;  %v2558_v8 = vadd.f32 %v2401_v12, %v330_v33 }
  0xc3   :  { %1410 = vmatmul.mubr.msk.f32.gmra.mrb[6].mxu0 %vm62_vm0, %v2461_v48  ;;  %1434 = vmatmul.mubr.msk.f32.gmra.mrb[6].mxu1 %vm62_vm0, %v2472_v0  ;;  %v331_v60 = vmul.f32 %v2390_v5, %v292_v15  ;;  %v279_v19 = vmul.f32 %v2385_v3, %v2234_v32  ;;  %v355_v23 = vadd.f32 %v2401_v12, %v316_v54 }
  0xc4   :  { %584 = vmatprep.mubr.f32.mxu0 %v1864_v7  ;;  %728 = vmatprep.mubr.f32.mxu1 %v1864_v7  ;;  %v332_v51 = vmul.f32 %v2390_v5, %v293_v37  ;;  %v2578_v29 = vadd.f32 %v2401_v12, %v340_v58  ;;  %v317_v55 = vmul.f32 %v2390_v5, %v278_v18 }
  0xc5   :  { %v2565_v11 = vadd.f32 %v2401_v12, %v331_v60  ;;  %v318_v30 = vmul.f32 %v2390_v5, %v279_v19  ;;  %v280_v17 = vmul.f32 %v2385_v3, %v2241_v35  ;;  %v281_v36 = vmul.f32 %v2385_v3, %v2248_v38 }
  0xc6   :  { %v2570_v43 = vadd.f32 %v2401_v12, %v332_v51  ;;  %v356_v32 = vadd.f32 %v2401_v12, %v317_v55  ;;  %v284_v61 = vmul.f32 %v2385_v3, %v2269_v47  ;;  %v285_v10 = vmul.f32 %v2385_v3, %v2276_v50 }
  0xc7   :  { %1411 = vmatmul.mubr.msk.f32.gmra.mrb[8].mxu0 %vm62_vm0, %v2488_v63  ;;  %1435 = vmatmul.mubr.msk.f32.gmra.mrb[8].mxu1 %vm62_vm0, %v2491_v31  ;;  %v357_v27 = vadd.f32 %v2401_v12, %v318_v30  ;;  %v319_v22 = vmul.f32 %v2390_v5, %v280_v17  ;;  %v286_v47 = vmul.f32 %v2385_v3, %v2283_v53 }
  0xc8   :  { %590 = vmatprep.mubr.f32.mxu0 %v1864_v7  ;;  %734 = vmatprep.mubr.f32.mxu1 %v1864_v7  ;;  %v324_v6 = vmul.f32 %v2390_v5, %v285_v10 }
  0xc9   :  { %v358_v35 = vadd.f32 %v2401_v12, %v319_v22  ;;  %v325_v50 = vmul.f32 %v2390_v5, %v286_v47 }
  0xca   :  { %v363_v53 = vadd.f32 %v2401_v12, %v324_v6 }
  0xcb   :  { %1412 = vmatmul.mubr.msk.f32.gmra.mrb[10].mxu0 %vm62_vm0, %v2501_v9  ;;  %1436 = vmatmul.mubr.msk.f32.gmra.mrb[10].mxu1 %vm62_vm0, %v2510_v49 }
  0xcc   :  { %596 = vmatprep.mubr.f32.mxu0 %v1864_v7  ;;  %740 = vmatprep.mubr.f32.mxu1 %v1864_v7 }
  0xcf   :  { %1413 = vmatmul.mubr.msk.f32.gmra.mrb[12].mxu0 %vm62_vm0, %v2513_v26  ;;  %1437 = vmatmul.mubr.msk.f32.gmra.mrb[12].mxu1 %vm62_vm0, %v2529_v24 }
  0xd0   :  { %602 = vmatprep.mubr.f32.mxu0 %v1864_v7  ;;  %746 = vmatprep.mubr.f32.mxu1 %v1864_v7 }
  0xd3   :  { %1414 = vmatmul.mubr.msk.f32.gmra.mrb[14].mxu0 %vm62_vm0, %v355_v23  ;;  %1438 = vmatmul.mubr.msk.f32.gmra.mrb[14].mxu1 %vm62_vm0, %v2578_v29 }
  0xd4   :  { %608 = vmatprep.mubr.f32.mxu0 %v1864_v7  ;;  %1739 = vmatprep.mubr.msk.f32.mxu1 %vm62_vm0, %v2417_v25  ;;  %v320_v25 = vmul.f32 %v2390_v5, %v281_v36 }
  0xd6   :  { %v359_v38 = vadd.f32 %v2401_v12, %v320_v25 }
  0xd7   :  { %1415 = vmatmul.mubr.msk.f32.gmra.mrb[16].mxu0 %vm62_vm0, %v356_v32  ;;  %1740 = vmatmul.mubr.msk.f32.vlgmr.msra.gmra.mrb[16].mxu1 %vm62_vm0, %v2431_v39  ;;  %v282_v39 = vmul.f32 %v2385_v3, %v2255_v41 }
  0xd8   :  { %614 = vmatprep.mubr.f32.mxu0 %v1864_v7  ;;  %1742 = vmatprep.mubr.msk.f32.mxu1 %vm62_vm0, %v2441_v28 }
  0xd9   :  { %v321_v28 = vmul.f32 %v2390_v5, %v282_v39 }
  0xdb   :  { %1416 = vmatmul.mubr.msk.f32.gmra.mrb[18].mxu0 %vm62_vm0, %v357_v27  ;;  %1743 = vmatmul.mubr.msk.f32.gmra.mrb[18].mxu1 %vm62_vm0, %v2461_v48  ;;  %v283_v48 = vmul.f32 %v2385_v3, %v2262_v44  ;;  %v360_v41 = vadd.f32 %v2401_v12, %v321_v28  ;;  %v364_v3 = vadd.f32 %v2401_v12, %v325_v50 }
  0xdc   :  { %620 = vmatprep.mubr.f32.mxu0 %v1864_v7  ;;  %1745 = vmatprep.mubr.msk.f32.mxu1 %vm62_vm0, %v2488_v63  ;;  %v323_v63 = vmul.f32 %v2390_v5, %v284_v61 }
  0xdd   :  { %v322_v57 = vmul.f32 %v2390_v5, %v283_v48  ;;  %v390_v5 = vlaneseq }
  0xde   :  { %v362_v2 = vadd.f32 %v2401_v12, %v323_v63 }
  0xdf   :  { %1417 = vmatmul.mubr.msk.f32.gmra.mrb[20].mxu0 %vm62_vm0, %v358_v35  ;;  %1746 = vmatmul.mubr.msk.f32.gmra.mrb[20].mxu1 %vm62_vm0, %v2501_v9  ;;  %v361_v44 = vadd.f32 %v2401_v12, %v322_v57  ;;  %v391_v12 = vshrl.u32 %v390_v5, 7 }
  0xe0   :  { %626 = vmatprep.mubr.f32.mxu0 %v1864_v7  ;;  %1748 = vmatprep.mubr.msk.f32.mxu1 %vm62_vm0, %v2513_v26 }
  0xe3   :  { %1418 = vmatmul.mubr.msk.f32.gmra.mrb[22].mxu0 %vm62_vm0, %v359_v38  ;;  %1749 = vmatmul.mubr.msk.f32.gmra.mrb[22].mxu1 %vm62_vm0, %v355_v23 }
  0xe4   :  { %632 = vmatprep.mubr.f32.mxu0 %v1864_v7  ;;  %1751 = vmatprep.mubr.msk.f32.mxu1 %vm62_vm0, %v356_v32 }
  0xe7   :  { %1419 = vmatmul.mubr.msk.f32.gmra.mrb[24].mxu0 %vm62_vm0, %v360_v41  ;;  %1752 = vmatmul.mubr.msk.f32.gmra.mrb[24].mxu1 %vm62_vm0, %v357_v27 }
  0xe8   :  { %638 = vmatprep.mubr.f32.mxu0 %v1864_v7  ;;  %1754 = vmatprep.mubr.msk.f32.mxu1 %vm62_vm0, %v358_v35 }
  0xeb   :  { %1420 = vmatmul.mubr.msk.f32.gmra.mrb[26].mxu0 %vm62_vm0, %v361_v44  ;;  %1755 = vmatmul.mubr.msk.f32.gmra.mrb[26].mxu1 %vm62_vm0, %v359_v38 }
  0xec   :  { %644 = vmatprep.mubr.f32.mxu0 %v1864_v7  ;;  %1757 = vmatprep.mubr.msk.f32.mxu1 %vm62_vm0, %v360_v41 }
  0xef   :  { %1421 = vmatmul.mubr.msk.f32.gmra.mrb[28].mxu0 %vm62_vm0, %v362_v2  ;;  %1758 = vmatmul.mubr.msk.f32.gmra.mrb[28].mxu1 %vm62_vm0, %v361_v44 }
  0xf0   :  { %650 = vmatprep.mubr.f32.mxu0 %v1864_v7  ;;  %1760 = vmatprep.mubr.msk.f32.mxu1 %vm62_vm0, %v362_v2 }
  0xf3   :  { %1422 = vmatmul.mubr.msk.f32.gmra.mrb[30].mxu0 %vm62_vm0, %v363_v53  ;;  %1761 = vmatmul.mubr.msk.f32.gmra.mrb[30].mxu1 %vm62_vm0, %v363_v53 }
  0xf4   :  { %656 = vmatprep.mubr.f32.mxu0 %v1864_v7  ;;  %1763 = vmatprep.mubr.msk.f32.mxu1 %vm62_vm0, %v364_v3 }
  0xf7   :  { %1423 = vmatmul.mubr.msk.f32.gmra.mrb[32].mxu0 %vm62_vm0, %v364_v3  ;;  %1764 = vmatmul.mubr.msk.f32.gmra.mrb[32].mxu1 %vm62_vm0, %v2532_v4 }
  0xf8   :  { %662 = vmatprep.mubr.f32.mxu0 %v1864_v7  ;;  %1766 = vmatprep.mubr.msk.f32.mxu1 %vm62_vm0, %v2536_v46 }
  0xfb   :  { %1424 = vmatmul.mubr.msk.f32.gmra.mrb[34].mxu0 %vm62_vm0, %v2532_v4  ;;  %1767 = vmatmul.mubr.msk.f32.gmra.mrb[34].mxu1 %vm62_vm0, %v2539_v14 }
  0xfc   :  { %668 = vmatprep.mubr.f32.mxu0 %v1864_v7  ;;  %1769 = vmatprep.mubr.msk.f32.mxu1 %vm62_vm0, %v2548_v34 }
  0xff   :  { %1425 = vmatmul.mubr.msk.f32.gmra.mrb[36].mxu0 %vm62_vm0, %v2536_v46  ;;  %1770 = vmatmul.mubr.msk.f32.gmra.mrb[36].mxu1 %vm62_vm0, %v2558_v8 }
 0x100   :  { %674 = vmatprep.mubr.f32.mxu0 %v1864_v7  ;;  %1772 = vmatprep.mubr.msk.f32.mxu1 %vm62_vm0, %v2565_v11 }
 0x103   :  { %1426 = vmatmul.mubr.msk.f32.gmra.mrb[38].mxu0 %vm62_vm0, %v2539_v14  ;;  %1773 = vmatmul.mubr.msk.f32.gmra.mrb[38].mxu1 %vm62_vm0, %v2570_v43 }
 0x104   :  { %680 = vmatprep.mubr.f32.mxu0 %v1864_v7  ;;  %1775 = vmatprep.mubr.msk.f32.mxu1 %vm62_vm0, %v2420_v52  ;;  %v392_v52 = vsub.s32 0, %v391_v12 }
 0x107   :  { %1427 = vmatmul.mubr.msk.f32.gmra.mrb[40].mxu0 %vm62_vm0, %v2548_v34  ;;  %1776 = vmatmul.mubr.msk.f32.gmra.mrb[40].mxu1 %vm62_vm0, %v2434_v42  ;;  %v388_v42 = vld [vmem:[%s2853_s4] sm:$0x3] }
 0x108   :  { %686 = vmatprep.mubr.f32.mxu0 %v1864_v7  ;;  %1778 = vmatprep.mubr.msk.f32.mxu1 %vm62_vm0, %v2450_v21  ;;  %v396_v21 = vsub.s32 1, %v391_v12 }
 0x10b   :  { %1428 = vmatmul.mubr.msk.f32.gmra.mrb[42].mxu0 %vm62_vm0, %v2558_v8  ;;  %1779 = vmatmul.mubr.msk.f32.gmra.mrb[42].mxu1 %vm62_vm0, %v2472_v0  ;;  %v2713_v0 = vrot.slane %v388_v42, %v392_v52 }
 0x10c   :  { %692 = vmatprep.mubr.f32.mxu0 %v1864_v7  ;;  %1781 = vmatprep.mubr.msk.f32.mxu1 %vm62_vm0, %v2491_v31 }
 0x10f   :  { %1429 = vmatmul.mubr.msk.f32.gmra.mrb[44].mxu0 %vm62_vm0, %v2565_v11  ;;  %1782 = vmatmul.mubr.msk.f32.gmra.mrb[44].mxu1 %vm62_vm0, %v2510_v49 }
 0x110   :  { %698 = vmatprep.mubr.f32.mxu0 %v1864_v7  ;;  %1784 = vmatprep.mubr.msk.f32.mxu1 %vm62_vm0, %v2529_v24  ;;  %v2715_v7 = vrot.slane %v388_v42, %v396_v21 }
 0x113   :  { %1430 = vmatmul.mubr.msk.f32.gmra.mrb[46].mxu0 %vm62_vm0, %v2570_v43  ;;  %1785 = vmatmul.mubr.msk.f32.gmra.mrb[46].mxu1 %vm62_vm0, %v2578_v29 }
 0x18a   :  { %v562_v31 = vpop.f32.mrb[0].mxu0  ;;  %v706_v9 = vpop.f32.mrb[0].mxu1 }
 0x18b   :  { %v563_v40 = vadd.f32 %v562_v31, %v2713_v0  ;;  %v707_v45 = vadd.f32 %v706_v9, %v2713_v0  ;;  %v564_v13 = vpop.f32.mrb[1].mxu0  ;;  %v708_v49 = vpop.f32.mrb[1].mxu1 }
 0x18c   :  { %v565_v26 = vadd.f32 %v564_v13, %v2715_v7  ;;  %v709_v56 = vadd.f32 %v708_v49, %v2715_v7 }
 0x18e   :  { %v1536_v20 = vpack.c.bf16 %v565_v26, %v563_v40  ;;  %v1560_v59 = vpack.c.bf16 %v709_v56, %v707_v45  ;;  %v568_v62 = vpop.f32.mrb[2].mxu0  ;;  %v712_v1 = vpop.f32.mrb[2].mxu1 }
 0x18f   :  { %v569_v24 = vadd.f32 %v568_v62, %v2713_v0  ;;  %v713_v4 = vadd.f32 %v712_v1, %v2713_v0  ;;  %v570_v16 = vpop.f32.mrb[3].mxu0  ;;  %v714_v46 = vpop.f32.mrb[3].mxu1 }
 0x190   :  { %1181 = vst [vmem:[#allocation2] sm:$0xff] %v1536_v20  ;;  %1205 = vst [vmem:[#allocation2 + $0xc0] sm:$0xff] %v1560_v59  ;;  %v571_v14 = vadd.f32 %v570_v16, %v2715_v7  ;;  %v715_v33 = vadd.f32 %v714_v46, %v2715_v7 }
 0x192   :  { %v1537_v15 = vpack.c.bf16 %v571_v14, %v569_v24  ;;  %v1561_v54 = vpack.c.bf16 %v715_v33, %v713_v4  ;;  %v574_v18 = vpop.f32.mrb[4].mxu0  ;;  %v718_v34 = vpop.f32.mrb[4].mxu1  ;;  %v2752_v14 = vld [vmem:[%s2855_s6] ss:$0 sm:$0xff]  ;;  %s1865_s6 = smov [#allocation2]  }
 0x193   :  { %v575_v37 = vadd.f32 %v574_v18, %v2713_v0  ;;  %v719_v58 = vadd.f32 %v718_v34, %v2713_v0  ;;  %v576_v8 = vpop.f32.mrb[5].mxu0  ;;  %v720_v60 = vpop.f32.mrb[5].mxu1  ;;  %s1378_s27 = sshll.u32 %s1865_s6, 4  ;;  %s1379_s27 = int_to_ptr.vmem [resolvable:$true] %s1378_s27 }
 0x194   :  { %1182 = vst [vmem:[#allocation2 + $0x8] sm:$0xff] %v1537_v15  ;;  %1206 = vst [vmem:[#allocation2 + $0xc8] sm:$0xff] %v1561_v54  ;;  %v577_v51 = vadd.f32 %v576_v8, %v2715_v7  ;;  %v721_v11 = vadd.f32 %v720_v60, %v2715_v7  ;;  %s1816_s29 = scalar_lea.vmem %s1379_s27, 4096  ;;  %p1821_p1 = scmp.lt.s32.totalorder %s1379_s27, %s1379_s27 }
 0x195   :  { %p1817_p0 = scmp.ne.s32.totalorder %s1379_s27, %s1816_s29  ;;  %p1822_p2 = scmp.lt.s32.totalorder %s1816_s29, %s1816_s29 }
 0x196   :  { %v1538_v19 = vpack.c.bf16 %v577_v51, %v575_v37  ;;  %v1562_v43 = vpack.c.bf16 %v721_v11, %v719_v58  ;;  %v580_v23 = vpop.f32.mrb[6].mxu0  ;;  %v724_v29 = vpop.f32.mrb[6].mxu1 }
 0x197   :  { %v581_v55 = vadd.f32 %v580_v23, %v2713_v0  ;;  %v725_v32 = vadd.f32 %v724_v29, %v2713_v0  ;;  %v582_v30 = vpop.f32.mrb[7].mxu0  ;;  %v726_v17 = vpop.f32.mrb[7].mxu1  ;;  %p1823_p3 = por %p1822_p2, %p1821_p1 }
 0x198   :  { %1183 = vst [vmem:[#allocation2 + $0x10] sm:$0xff] %v1538_v19  ;;  %1207 = vst [vmem:[#allocation2 + $0xd0] sm:$0xff] %v1562_v43  ;;  %v583_v27 = vadd.f32 %v582_v30, %v2715_v7  ;;  %v727_v22 = vadd.f32 %v726_v17, %v2715_v7 }
 0x199   :  { %p1824_p4 = pnand %p1823_p3, %p1817_p0 }
 0x19a   :  { %v1539_v36 = vpack.c.bf16 %v583_v27, %v581_v55  ;;  %v1563_v35 = vpack.c.bf16 %v727_v22, %v725_v32  ;;  %v586_v25 = vpop.f32.mrb[8].mxu0  ;;  %v730_v39 = vpop.f32.mrb[8].mxu1 }
 0x19b   :  { %v587_v38 = vadd.f32 %v586_v25, %v2713_v0  ;;  %v731_v28 = vadd.f32 %v730_v39, %v2713_v0  ;;  %v588_v48 = vpop.f32.mrb[9].mxu0  ;;  %v732_v41 = vpop.f32.mrb[9].mxu1 }
 0x19c   :  { %1184 = vst [vmem:[#allocation2 + $0x18] sm:$0xff] %v1539_v36  ;;  %1208 = vst [vmem:[#allocation2 + $0xd8] sm:$0xff] %v1563_v35  ;;  %v589_v57 = vadd.f32 %v588_v48, %v2715_v7  ;;  %v733_v61 = vadd.f32 %v732_v41, %v2715_v7 }
 0x19e   :  { %v1540_v44 = vpack.c.bf16 %v589_v57, %v587_v38  ;;  %v1564_v63 = vpack.c.bf16 %v733_v61, %v731_v28  ;;  %v592_v10 = vpop.f32.mrb[10].mxu0  ;;  %v736_v47 = vpop.f32.mrb[10].mxu1 }
 0x19f   :  { %v593_v2 = vadd.f32 %v592_v10, %v2713_v0  ;;  %v737_v6 = vadd.f32 %v736_v47, %v2713_v0  ;;  %v594_v50 = vpop.f32.mrb[11].mxu0  ;;  %v738_v53 = vpop.f32.mrb[11].mxu1 }
 0x1a0   :  { %1185 = vst [vmem:[#allocation2 + $0x20] sm:$0xff] %v1540_v44  ;;  %1209 = vst [vmem:[#allocation2 + $0xe0] sm:$0xff] %v1564_v63  ;;  %v595_v3 = vadd.f32 %v594_v50, %v2715_v7  ;;  %v739_v5 = vadd.f32 %v738_v53, %v2715_v7 }
 0x1a2   :  { %v1541_v12 = vpack.c.bf16 %v595_v3, %v593_v2  ;;  %v1565_v52 = vpack.c.bf16 %v739_v5, %v737_v6  ;;  %v598_v42 = vpop.f32.mrb[12].mxu0  ;;  %v742_v21 = vpop.f32.mrb[12].mxu1 }
 0x1a3   :  { %v599_v31 = vadd.f32 %v598_v42, %v2713_v0  ;;  %v743_v9 = vadd.f32 %v742_v21, %v2713_v0  ;;  %v600_v40 = vpop.f32.mrb[13].mxu0  ;;  %v744_v45 = vpop.f32.mrb[13].mxu1 }
 0x1a4   :  { %1186 = vst [vmem:[#allocation2 + $0x28] sm:$0xff] %v1541_v12  ;;  %1210 = vst [vmem:[#allocation2 + $0xe8] sm:$0xff] %v1565_v52  ;;  %v601_v13 = vadd.f32 %v600_v40, %v2715_v7  ;;  %v745_v49 = vadd.f32 %v744_v45, %v2715_v7 }
 0x1a6   :  { %v1542_v26 = vpack.c.bf16 %v601_v13, %v599_v31  ;;  %v1566_v56 = vpack.c.bf16 %v745_v49, %v743_v9  ;;  %v604_v20 = vpop.f32.mrb[14].mxu0  ;;  %v748_v59 = vpop.f32.mrb[14].mxu1 }
 0x1a7   :  { %v605_v62 = vadd.f32 %v604_v20, %v2713_v0  ;;  %v749_v1 = vadd.f32 %v748_v59, %v2713_v0  ;;  %v606_v24 = vpop.f32.mrb[15].mxu0  ;;  %v750_v4 = vpop.f32.mrb[15].mxu1 }
 0x1a8   :  { %1187 = vst [vmem:[#allocation2 + $0x30] sm:$0xff] %v1542_v26  ;;  %1211 = vst [vmem:[#allocation2 + $0xf0] sm:$0xff] %v1566_v56  ;;  %v607_v16 = vadd.f32 %v606_v24, %v2715_v7  ;;  %v751_v46 = vadd.f32 %v750_v4, %v2715_v7 }
 0x1aa   :  { %v1543_v33 = vpack.c.bf16 %v607_v16, %v605_v62  ;;  %v1567_v15 = vpack.c.bf16 %v751_v46, %v749_v1  ;;  %v610_v54 = vpop.f32.mrb[16].mxu0  ;;  %v1741_v18 = vpop.f32.mrb[16].mxu1 }
 0x1ab   :  { %v611_v34 = vadd.f32 %v610_v54, %v2713_v0  ;;  %v836_v37 = vadd.f32 %v1741_v18, %v2752_v14  ;;  %v612_v58 = vpop.f32.mrb[17].mxu0  ;;  %v830_v8 = vpop.f32.mrb[17].mxu1 }
 0x1ac   :  { %1188 = vst [vmem:[#allocation2 + $0x38] sm:$0xff] %v1543_v33  ;;  %1212 = vst [vmem:[#allocation2 + $0xf8] sm:$0xff] %v1567_v15  ;;  %v613_v60 = vadd.f32 %v612_v58, %v2715_v7  ;;  %v831_v51 = vadd.f32 %v2752_v14, %v830_v8 }
 0x1ae   :  { %v1544_v11 = vpack.c.bf16 %v613_v60, %v611_v34  ;;  %v1603_v19 = vpack.c.bf16 %v836_v37, %v831_v51  ;;  %v616_v43 = vpop.f32.mrb[18].mxu0  ;;  %v1744_v23 = vpop.f32.mrb[18].mxu1 }
 0x1af   :  { %v617_v29 = vadd.f32 %v616_v43, %v2713_v0  ;;  %v846_v55 = vadd.f32 %v1744_v23, %v2752_v14  ;;  %v618_v32 = vpop.f32.mrb[19].mxu0  ;;  %v840_v30 = vpop.f32.mrb[19].mxu1 }
 0x1b0   :  { %1189 = vst [vmem:[#allocation2 + $0x40] sm:$0xff] %v1544_v11  ;;  %1604 = vst [vmem:[#allocation4] sm:$0xff] %v1603_v19   ;;  %v619_v17 = vadd.f32 %v618_v32, %v2715_v7  ;;  %v841_v27 = vadd.f32 %v2752_v14, %v840_v30 }
 0x1b2   :  { %v1545_v22 = vpack.c.bf16 %v619_v17, %v617_v29  ;;  %v1608_v36 = vpack.c.bf16 %v846_v55, %v841_v27  ;;  %v622_v35 = vpop.f32.mrb[20].mxu0  ;;  %v1747_v25 = vpop.f32.mrb[20].mxu1 }
 0x1b3   :  { %v623_v39 = vadd.f32 %v622_v35, %v2713_v0  ;;  %v856_v38 = vadd.f32 %v1747_v25, %v2752_v14  ;;  %v624_v28 = vpop.f32.mrb[21].mxu0  ;;  %v850_v48 = vpop.f32.mrb[21].mxu1 }
 0x1b4   :  { %1190 = vst [vmem:[#allocation2 + $0x48] sm:$0xff] %v1545_v22  ;;  %1680 = vst [vmem:[#allocation4 + $0x8] sm:$0xff] %v1608_v36   ;;  %v625_v41 = vadd.f32 %v624_v28, %v2715_v7  ;;  %v851_v57 = vadd.f32 %v2752_v14, %v850_v48 }
 0x1b6   :  { %v1546_v61 = vpack.c.bf16 %v625_v41, %v623_v39  ;;  %v1613_v44 = vpack.c.bf16 %v856_v38, %v851_v57  ;;  %v628_v63 = vpop.f32.mrb[22].mxu0  ;;  %v1750_v10 = vpop.f32.mrb[22].mxu1 }
 0x1b7   :  { %v629_v47 = vadd.f32 %v628_v63, %v2713_v0  ;;  %v866_v2 = vadd.f32 %v1750_v10, %v2752_v14  ;;  %v630_v6 = vpop.f32.mrb[23].mxu0  ;;  %v860_v50 = vpop.f32.mrb[23].mxu1 }
 0x1b8   :  { %1191 = vst [vmem:[#allocation2 + $0x50] sm:$0xff] %v1546_v61  ;;  %1681 = vst [vmem:[#allocation4 + $0x10] sm:$0xff] %v1613_v44   ;;  %v631_v53 = vadd.f32 %v630_v6, %v2715_v7  ;;  %v861_v3 = vadd.f32 %v2752_v14, %v860_v50 }
 0x1ba   :  { %v1547_v5 = vpack.c.bf16 %v631_v53, %v629_v47  ;;  %v1618_v12 = vpack.c.bf16 %v866_v2, %v861_v3  ;;  %v634_v52 = vpop.f32.mrb[24].mxu0  ;;  %v1753_v42 = vpop.f32.mrb[24].mxu1 }
 0x1bb   :  { %v635_v21 = vadd.f32 %v634_v52, %v2713_v0  ;;  %v876_v31 = vadd.f32 %v1753_v42, %v2752_v14  ;;  %v636_v9 = vpop.f32.mrb[25].mxu0  ;;  %v870_v40 = vpop.f32.mrb[25].mxu1 }
 0x1bc   :  { %1192 = vst [vmem:[#allocation2 + $0x58] sm:$0xff] %v1547_v5  ;;  %1682 = vst [vmem:[#allocation4 + $0x18] sm:$0xff] %v1618_v12   ;;  %v637_v45 = vadd.f32 %v636_v9, %v2715_v7  ;;  %v871_v13 = vadd.f32 %v2752_v14, %v870_v40 }
 0x1be   :  { %v1548_v49 = vpack.c.bf16 %v637_v45, %v635_v21  ;;  %v1623_v26 = vpack.c.bf16 %v876_v31, %v871_v13  ;;  %v640_v56 = vpop.f32.mrb[26].mxu0  ;;  %v1756_v20 = vpop.f32.mrb[26].mxu1 }
 0x1bf   :  { %v641_v59 = vadd.f32 %v640_v56, %v2713_v0  ;;  %v886_v62 = vadd.f32 %v1756_v20, %v2752_v14  ;;  %v642_v1 = vpop.f32.mrb[27].mxu0  ;;  %v880_v24 = vpop.f32.mrb[27].mxu1 }
 0x1c0   :  { %1193 = vst [vmem:[#allocation2 + $0x60] sm:$0xff] %v1548_v49  ;;  %1683 = vst [vmem:[#allocation4 + $0x20] sm:$0xff] %v1623_v26   ;;  %v643_v4 = vadd.f32 %v642_v1, %v2715_v7  ;;  %v881_v16 = vadd.f32 %v2752_v14, %v880_v24 }
 0x1c2   :  { %v1549_v46 = vpack.c.bf16 %v643_v4, %v641_v59  ;;  %v1628_v33 = vpack.c.bf16 %v886_v62, %v881_v16  ;;  %v646_v15 = vpop.f32.mrb[28].mxu0  ;;  %v1759_v54 = vpop.f32.mrb[28].mxu1 }
 0x1c3   :  { %v647_v18 = vadd.f32 %v646_v15, %v2713_v0  ;;  %v896_v34 = vadd.f32 %v1759_v54, %v2752_v14  ;;  %v648_v37 = vpop.f32.mrb[29].mxu0  ;;  %v890_v58 = vpop.f32.mrb[29].mxu1 }
 0x1c4   :  { %1194 = vst [vmem:[#allocation2 + $0x68] sm:$0xff] %v1549_v46  ;;  %1684 = vst [vmem:[#allocation4 + $0x28] sm:$0xff] %v1628_v33   ;;  %v649_v8 = vadd.f32 %v648_v37, %v2715_v7  ;;  %v891_v60 = vadd.f32 %v2752_v14, %v890_v58 }
 0x1c6   :  { %v1550_v51 = vpack.c.bf16 %v649_v8, %v647_v18  ;;  %v1633_v11 = vpack.c.bf16 %v896_v34, %v891_v60  ;;  %v652_v19 = vpop.f32.mrb[30].mxu0  ;;  %v1762_v43 = vpop.f32.mrb[30].mxu1 }
 0x1c7   :  { %v653_v23 = vadd.f32 %v652_v19, %v2713_v0  ;;  %v906_v29 = vadd.f32 %v1762_v43, %v2752_v14  ;;  %v654_v55 = vpop.f32.mrb[31].mxu0  ;;  %v900_v32 = vpop.f32.mrb[31].mxu1 }
 0x1c8   :  { %1195 = vst [vmem:[#allocation2 + $0x70] sm:$0xff] %v1550_v51  ;;  %1685 = vst [vmem:[#allocation4 + $0x30] sm:$0xff] %v1633_v11   ;;  %v655_v30 = vadd.f32 %v654_v55, %v2715_v7  ;;  %v901_v17 = vadd.f32 %v2752_v14, %v900_v32 }
 0x1ca   :  { %v1551_v27 = vpack.c.bf16 %v655_v30, %v653_v23  ;;  %v1638_v22 = vpack.c.bf16 %v906_v29, %v901_v17  ;;  %v658_v36 = vpop.f32.mrb[32].mxu0  ;;  %v1765_v35 = vpop.f32.mrb[32].mxu1 }
 0x1cb   :  { %v659_v25 = vadd.f32 %v658_v36, %v2713_v0  ;;  %v916_v39 = vadd.f32 %v1765_v35, %v2752_v14  ;;  %v660_v38 = vpop.f32.mrb[33].mxu0  ;;  %v910_v28 = vpop.f32.mrb[33].mxu1 }
 0x1cc   :  { %1196 = vst [vmem:[#allocation2 + $0x78] sm:$0xff] %v1551_v27  ;;  %1686 = vst [vmem:[#allocation4 + $0x38] sm:$0xff] %v1638_v22   ;;  %v661_v48 = vadd.f32 %v660_v38, %v2715_v7  ;;  %v911_v41 = vadd.f32 %v2752_v14, %v910_v28 }
 0x1ce   :  { %v1552_v57 = vpack.c.bf16 %v661_v48, %v659_v25  ;;  %v1643_v61 = vpack.c.bf16 %v916_v39, %v911_v41  ;;  %v664_v44 = vpop.f32.mrb[34].mxu0  ;;  %v1768_v63 = vpop.f32.mrb[34].mxu1 }
 0x1cf   :  { %v665_v10 = vadd.f32 %v664_v44, %v2713_v0  ;;  %v926_v47 = vadd.f32 %v1768_v63, %v2752_v14  ;;  %v666_v2 = vpop.f32.mrb[35].mxu0  ;;  %v920_v6 = vpop.f32.mrb[35].mxu1 }
 0x1d0   :  { %1197 = vst [vmem:[#allocation2 + $0x80] sm:$0xff] %v1552_v57  ;;  %1687 = vst [vmem:[#allocation4 + $0x40] sm:$0xff] %v1643_v61   ;;  %v667_v50 = vadd.f32 %v666_v2, %v2715_v7  ;;  %v921_v53 = vadd.f32 %v2752_v14, %v920_v6 }
 0x1d2   :  { %v1553_v3 = vpack.c.bf16 %v667_v50, %v665_v10  ;;  %v1648_v5 = vpack.c.bf16 %v926_v47, %v921_v53  ;;  %v670_v12 = vpop.f32.mrb[36].mxu0  ;;  %v1771_v52 = vpop.f32.mrb[36].mxu1 }
 0x1d3   :  { %v671_v42 = vadd.f32 %v670_v12, %v2713_v0  ;;  %v936_v21 = vadd.f32 %v1771_v52, %v2752_v14  ;;  %v672_v31 = vpop.f32.mrb[37].mxu0  ;;  %v930_v9 = vpop.f32.mrb[37].mxu1 }
 0x1d4   :  { %1198 = vst [vmem:[#allocation2 + $0x88] sm:$0xff] %v1553_v3  ;;  %1688 = vst [vmem:[#allocation4 + $0x48] sm:$0xff] %v1648_v5   ;;  %v673_v40 = vadd.f32 %v672_v31, %v2715_v7  ;;  %v931_v45 = vadd.f32 %v2752_v14, %v930_v9 }
 0x1d6   :  { %v1554_v13 = vpack.c.bf16 %v673_v40, %v671_v42  ;;  %v1653_v49 = vpack.c.bf16 %v936_v21, %v931_v45  ;;  %v676_v26 = vpop.f32.mrb[38].mxu0  ;;  %v1774_v56 = vpop.f32.mrb[38].mxu1 }
 0x1d7   :  { %v677_v20 = vadd.f32 %v676_v26, %v2713_v0  ;;  %v946_v59 = vadd.f32 %v1774_v56, %v2752_v14  ;;  %v678_v62 = vpop.f32.mrb[39].mxu0  ;;  %v940_v1 = vpop.f32.mrb[39].mxu1 }
 0x1d8   :  { %1199 = vst [vmem:[#allocation2 + $0x90] sm:$0xff] %v1554_v13  ;;  %1689 = vst [vmem:[#allocation4 + $0x50] sm:$0xff] %v1653_v49   ;;  %v679_v24 = vadd.f32 %v678_v62, %v2715_v7  ;;  %v941_v4 = vadd.f32 %v2752_v14, %v940_v1 }
 0x1da   :  { %v1555_v16 = vpack.c.bf16 %v679_v24, %v677_v20  ;;  %v1658_v46 = vpack.c.bf16 %v946_v59, %v941_v4  ;;  %v682_v33 = vpop.f32.mrb[40].mxu0  ;;  %v1777_v15 = vpop.f32.mrb[40].mxu1 }
 0x1db   :  { %v683_v54 = vadd.f32 %v682_v33, %v2713_v0  ;;  %v956_v18 = vadd.f32 %v1777_v15, %v2752_v14  ;;  %v684_v34 = vpop.f32.mrb[41].mxu0  ;;  %v950_v37 = vpop.f32.mrb[41].mxu1 }
 0x1dc   :  { %1200 = vst [vmem:[#allocation2 + $0x98] sm:$0xff] %v1555_v16  ;;  %1690 = vst [vmem:[#allocation4 + $0x58] sm:$0xff] %v1658_v46   ;;  %v685_v58 = vadd.f32 %v684_v34, %v2715_v7  ;;  %v951_v8 = vadd.f32 %v2752_v14, %v950_v37 }
 0x1de   :  { %v1556_v60 = vpack.c.bf16 %v685_v58, %v683_v54  ;;  %v1663_v51 = vpack.c.bf16 %v956_v18, %v951_v8  ;;  %v688_v11 = vpop.f32.mrb[42].mxu0  ;;  %v1780_v19 = vpop.f32.mrb[42].mxu1 }
 0x1df   :  { %v689_v43 = vadd.f32 %v688_v11, %v2713_v0  ;;  %v966_v23 = vadd.f32 %v1780_v19, %v2752_v14  ;;  %v690_v29 = vpop.f32.mrb[43].mxu0  ;;  %v960_v55 = vpop.f32.mrb[43].mxu1 }
 0x1e0   :  { %1201 = vst [vmem:[#allocation2 + $0xa0] sm:$0xff] %v1556_v60  ;;  %1691 = vst [vmem:[#allocation4 + $0x60] sm:$0xff] %v1663_v51   ;;  %v691_v32 = vadd.f32 %v690_v29, %v2715_v7  ;;  %v961_v30 = vadd.f32 %v2752_v14, %v960_v55 }
 0x1e2   :  { %v1557_v17 = vpack.c.bf16 %v691_v32, %v689_v43  ;;  %v1668_v27 = vpack.c.bf16 %v966_v23, %v961_v30  ;;  %v694_v22 = vpop.f32.mrb[44].mxu0  ;;  %v1783_v36 = vpop.f32.mrb[44].mxu1 }
 0x1e3   :  { %v695_v35 = vadd.f32 %v694_v22, %v2713_v0  ;;  %v976_v25 = vadd.f32 %v1783_v36, %v2752_v14  ;;  %v696_v39 = vpop.f32.mrb[45].mxu0  ;;  %v970_v38 = vpop.f32.mrb[45].mxu1 }
 0x1e4   :  { %1202 = vst [vmem:[#allocation2 + $0xa8] sm:$0xff] %v1557_v17  ;;  %1692 = vst [vmem:[#allocation4 + $0x68] sm:$0xff] %v1668_v27   ;;  %v697_v28 = vadd.f32 %v696_v39, %v2715_v7  ;;  %v971_v48 = vadd.f32 %v2752_v14, %v970_v38 }
 0x1e6   :  { %v1558_v41 = vpack.c.bf16 %v697_v28, %v695_v35  ;;  %v1673_v57 = vpack.c.bf16 %v976_v25, %v971_v48  ;;  %v700_v61 = vpop.f32.mrb[46].mxu0  ;;  %v1786_v44 = vpop.f32.mrb[46].mxu1 }
 0x1e7   :  { %v701_v63 = vadd.f32 %v700_v61, %v2713_v0  ;;  %v986_v10 = vadd.f32 %v1786_v44, %v2752_v14  ;;  %v702_v47 = vpop.f32.mrb[47].mxu0  ;;  %v980_v2 = vpop.f32.mrb[47].mxu1 }
 0x1e8   :  { %1203 = vst [vmem:[#allocation2 + $0xb0] sm:$0xff] %v1558_v41  ;;  %1693 = vst [vmem:[#allocation4 + $0x70] sm:$0xff] %v1673_v57   ;;  %v703_v6 = vadd.f32 %v702_v47, %v2715_v7  ;;  %v981_v50 = vadd.f32 %v2752_v14, %v980_v2 }
 0x1ea   :  { %v1559_v53 = vpack.c.bf16 %v703_v6, %v701_v63  ;;  %v1678_v3 = vpack.c.bf16 %v986_v10, %v981_v50 }
 0x1ec   :  { %1204 = vst [vmem:[#allocation2 + $0xb8] sm:$0xff] %v1559_v53  ;;  %1694 = vst [vmem:[#allocation4 + $0x78] sm:$0xff] %v1678_v3  }
 0x1ed   :  { %1827 = shalt.err (!%p1824_p4)
}
 0x1ee   :  { %s1828_s10 = scalar_lea.hbm %s2856_s7, 4096 }
 0x1ef   :  { %p1829_p5 = scmp.ne.s32.totalorder %s2856_s7, %s1828_s10  ;;  %p1832_p6 = scmp.lt.u32.totalorder %s1828_s10, %s2856_s7 }
 0x1f1   :  { %p1834_p7 = pnand %p1832_p6, %p1829_p5 }
 0x1f3   :  { %1837 = shalt.err (!%p1834_p7)
}
 0x1f4   :  { %s1867_s15 = smov 128   ;;  %s1868_s16 = smov 8  }
 0x1f5   :  { %1384 = dma.vmem_to_hbm [thread:$0]  %s1379_s27, 4096, %s2856_s7, [#allocation3], %s1867_s15, %s1867_s15, %s1868_s16  }
 0x1f6   :  { %s1838_s19 = scalar_lea.vmem %s2818_s3, 2048  ;;  %p1843_p9 = scmp.lt.s32.totalorder %s2818_s3, %s2818_s3 }
 0x1f7   :  { %p1839_p8 = scmp.ne.s32.totalorder %s2818_s3, %s1838_s19  ;;  %p1844_p10 = scmp.lt.s32.totalorder %s1838_s19, %s1838_s19 }
 0x1f9   :  { %p1845_p11 = por %p1844_p10, %p1843_p9 }
 0x1fb   :  { %p1846_p12 = pnand %p1845_p11, %p1839_p8 }
 0x1fd   :  { %1849 = shalt.err (!%p1846_p12)
}
 0x1fe   :  { %s1850_s21 = scalar_lea.hbm %s2857_s8, 2048 }
 0x1ff   :  { %p1851_p13 = scmp.ne.s32.totalorder %s2857_s8, %s1850_s21  ;;  %p1854_p0 = scmp.lt.u32.totalorder %s1850_s21, %s2857_s8 }
 0x201   :  { %p1856_p1 = pnand %p1854_p0, %p1851_p13 }
 0x203   :  { %1859 = shalt.err (!%p1856_p1)
}
 0x204   :  { %s1869_s7 = smov 64   ;;  %s1870_s25 = smov 4  }
 0x205   :  { %1396 = dma.vmem_to_hbm [thread:$0]  %s2818_s3, 2048, %s2857_s8, [#allocation5], %s1869_s7, %s1869_s7, %s1870_s25  }
 0x206   :  { %1860 = dma.done.wait [#allocation3], 4096  }
 0x207   :  { %1861 = vsyncadd [#allocation3], 4294963200 }
 0x208   :  { %1862 = dma.done.wait [#allocation5], 2048  }
 0x209   :  { %1863 = vsyncadd [#allocation5], 4294965248 }
 0x20a   :  { %1403 = vsyncpa [#allocation3], 1 }
 0x20b   :  { %1404 = vsyncpa [#allocation5], 1 }

</bundles_post_ra>
